<compile_context>
chip_gen: v7x
topology: tpu7x:2x2x1
jax: 0.10.0
libtpu: 0.0.40
codegen_flags: <defaults>
</compile_context>

<pallas_src>
import functools

import jax
import jax.numpy as jnp
from jax.experimental import pallas as pl
from jax.experimental.pallas import tpu as pltpu


def _round_up(n, m):
    return (n + m - 1) // m * m


# ----------------------------- Pallas kernel --------------------------------
def char_cnn_kernel(x_ref, m_ref, w_ref, b_ref, o_ref):
    """One token tile of the CharCNN encoding.

    x_ref : [tn, L*D]   bf16 char embeddings, char-position-major, lane-dense
    m_ref : [tn, L]     f32 char mask (1.0 = real char, 0.0 = pad)
    w_ref : [L*D, L*Co] bf16 banded (block-tridiagonal) conv weight
    b_ref : [1, Co]     f32 conv bias
    o_ref : [tn, Co]    f32 max-pooled conv features
    """
    # Single lane-dense MXU push: conv over the char axis for all L output
    # positions at once; s[n, l*Co + c] is the conv output at position l, chan c.
    s = jnp.dot(x_ref[...], w_ref[...], preferred_element_type=jnp.float32)  # [tn, L*Co]

    L = m_ref.shape[-1]
    Co = o_ref.shape[-1]
    pen = (1.0 - m_ref[...]) * 999.0                                         # [tn, L]

    # Masked max-pool over char positions via static lane slices (no reshapes).
    pooled = s[:, 0:Co] - pen[:, 0:1]
    for l in range(1, L):
        pooled = jnp.maximum(pooled, s[:, l * Co:(l + 1) * Co] - pen[:, l:l + 1])

    # Bias is constant over L, so adding it after the max is exact.
    o_ref[...] = (pooled + b_ref[...]).astype(o_ref.dtype)


def build_banded_conv_weight(w, L):
    """w: [K, D, Co] per-tap conv weights (== torch Conv2d(1,Co,(K,D)) weight[:,0,k,:].T).

    Returns W_full [L*D, L*Co], block-tridiagonal, such that
    (x.reshape(N, L*D) @ W_full)[n, lo*Co + c] == 'same'-padded conv over the char axis.
    """
    K, D, Co = w.shape
    pad = (K - 1) // 2
    W = jnp.zeros((L * D, L * Co), w.dtype)
    for lo in range(L):              # output char position
        for k in range(K):           # tap
            li = lo + k - pad        # input char position feeding this tap
            if 0 <= li < L:
                W = W.at[li * D:(li + 1) * D, lo * Co:(lo + 1) * Co].set(w[k])
    return W


def char_cnn_encode(x2d, mask, w_full, b, *, tn_max=1024):
    """x2d: [N, L*D] bf16, mask: [N, L] f32, w_full: [L*D, L*Co] bf16, b: [Co] f32
    -> [N, Co] f32."""
    N, LD = x2d.shape
    L = mask.shape[-1]
    b2 = b.reshape(1, -1).astype(jnp.float32)
    Co = b2.shape[-1]
    LCo = w_full.shape[-1]
    assert w_full.shape[0] == LD and LCo == L * Co

    # Tile selection: as large as possible (mem-bound kernel; wide tiles amortize the
    # ~0.35us/step pipeline overhead), multiple of 16 (bf16 sublane packing), and the
    # grid kept >= 2 steps so v7x megacore can shard the "parallel" axis.
    tn = min(tn_max, _round_up(max(pl.cdiv(N, 2), 16), 16))
    n_pad = _round_up(N, tn)
    if n_pad // tn < 2:
        n_pad = 2 * tn
    grid = n_pad // tn
    if n_pad > N:
        x2d = jnp.pad(x2d, ((0, n_pad - N), (0, 0)))
        mask = jnp.pad(mask, ((0, n_pad - N), (0, 0)))

    out = pl.pallas_call(
        char_cnn_kernel,
        out_shape=jax.ShapeDtypeStruct((n_pad, Co), jnp.float32),
        grid_spec=pltpu.PrefetchScalarGridSpec(
            num_scalar_prefetch=0,
            grid=(grid,),
            in_specs=[
                pl.BlockSpec((tn, LD), lambda i: (i, 0)),
                pl.BlockSpec((tn, L), lambda i: (i, 0)),
                pl.BlockSpec((LD, LCo), lambda i: (0, 0)),
                pl.BlockSpec((1, Co), lambda i: (0, 0)),
            ],
            out_specs=pl.BlockSpec((tn, Co), lambda i: (i, 0)),
        ),
        compiler_params=pltpu.CompilerParams(
            dimension_semantics=("parallel",)),
    )(x2d, mask, w_full, b2)
    return out[:N]


# ------------------------------ AllEmbedding ---------------------------------
def all_embedding_forward(params, t_indexs, c_indexs):
    """Replicates AllEmbedding.forward for the char_emb_dim > 0, CNN-encoder case.

    t_indexs: [bs, t_maxlen] int32 token ids (0 = [PAD])
    c_indexs: [bs, t_maxlen, c_maxlen] int32 char ids (0 = pad)
    returns (embeddings [bs, t_maxlen, token_emb_dim + char_emb_dim], masks [bs, t_maxlen] bool)
    """
    bs, t_maxlen = t_indexs.shape
    c_maxlen = c_indexs.shape[-1]

    masks = t_indexs != 0                      # Masking(t_indexs, mask_val=0)
    c_masks = c_indexs != 0                    # Masking(c_indexs, mask_val=0)
    # c_lens only feeds the LSTM branch; unused by the CNN char encoder.

    # embedding gathers (glue, plain JAX)
    t_emb = jnp.take(params["token_emb"], t_indexs, axis=0)                      # [bs, T, Dt]
    # Gather char embeddings in bf16: the CharCNN kernel is HBM-bandwidth-bound, so
    # halving the bytes of its dominant [N, L*D] input is the big lever.
    c_emb = jnp.take(params["char_emb"].astype(jnp.bfloat16), c_indexs, axis=0)  # [bs, T, L, Dc]
    # char_emb_dropout: identity in eval mode.

    # CharCNNEncoding: flatten tokens, run CNN hot path in Pallas.
    N = bs * t_maxlen
    D = params["char_emb"].shape[-1]
    x2d = c_emb.reshape(N, c_maxlen * D)                         # contiguous reshape (free)
    m = c_masks.reshape(N, c_maxlen).astype(jnp.float32)
    w_full = build_banded_conv_weight(params["conv_w"], c_maxlen)
    c_feat = char_cnn_encode(x2d, m, w_full.astype(jnp.bfloat16), params["conv_b"])
    c_feat = c_feat.reshape(bs, t_maxlen, -1)

    embeddings = jnp.concatenate([t_emb, c_feat.astype(t_emb.dtype)], axis=-1)
    return embeddings, masks


# ----------------------------- reference (jnp) --------------------------------
def char_cnn_ref(x, mask, w, b):
    """x: [N, L, D] f32, mask: [N, L] f32, w: [K, D, Co], b: [Co] -> [N, Co].
    Per-tap formulation, bias before mask+max (as in the PyTorch module)."""
    N, L, D = x.shape
    K = w.shape[0]
    pad = (K - 1) // 2
    xp = jnp.pad(x, ((0, 0), (pad, pad), (0, 0)))
    s = sum(jnp.einsum("nld,dc->nlc", xp[:, k:k + L], w[k]) for k in range(K))
    s = s + b.reshape(1, 1, -1)
    s = s - (1.0 - mask)[:, :, None] * 999.0
    return s.max(axis=1)


# ----------------------------------- main -------------------------------------
if __name__ == "__main__":
    # small config
    bs, t_maxlen, c_maxlen = 2, 8, 8
    vocab_size, token_emb_dim = 64, 32
    char_vocab, char_emb_dim = 1000, 16     # Co == _config.hidden_dim == char_emb_dim
    K = 3                                   # CharCNNEncoding -> CNNEncoding(Ks=[3])

    key = jax.random.PRNGKey(0)
    k_te, k_ce, k_w, k_b, k_ti, k_ci = jax.random.split(key, 6)

    params = {
        "token_emb": 0.02 * jax.random.normal(k_te, (vocab_size, token_emb_dim), jnp.float32),
        "char_emb": 0.02 * jax.random.normal(k_ce, (char_vocab, char_emb_dim), jnp.float32),
        # conv_w stored [K, D, Co] == torch Conv2d weight [Co,1,K,D] transposed per tap
        "conv_w": 0.1 * jax.random.normal(k_w, (K, char_emb_dim, char_emb_dim), jnp.float32),
        "conv_b": 0.1 * jax.random.normal(k_b, (char_emb_dim,), jnp.float32),
    }

    # synthetic index inputs with trailing padding (id 0)
    t_indexs = jax.random.randint(k_ti, (bs, t_maxlen), 1, vocab_size, jnp.int32)
    t_indexs = t_indexs.at[:, -2:].set(0)                     # pad last 2 tokens
    c_indexs = jax.random.randint(k_ci, (bs, t_maxlen, c_maxlen), 1, char_vocab, jnp.int32)
    c_indexs = c_indexs.at[:, :, -3:].set(0)                  # pad last 3 chars
    c_indexs = jnp.where(t_indexs[:, :, None] == 0, 0, c_indexs)

    embeddings, masks = jax.jit(functools.partial(all_embedding_forward, params))(
        t_indexs, c_indexs)
    jax.block_until_ready(embeddings)

    # correctness check of the Pallas hot path
    N = bs * t_maxlen
    x_f32 = jnp.take(params["char_emb"], c_indexs, axis=0).reshape(
        N, c_maxlen, char_emb_dim).astype(jnp.float32)
    m = (c_indexs != 0).reshape(N, c_maxlen).astype(jnp.float32)
    w_full = build_banded_conv_weight(params["conv_w"], c_maxlen)

    got = char_cnn_encode(x_f32.astype(jnp.bfloat16).reshape(N, -1), m,
                          w_full.astype(jnp.bfloat16), params["conv_b"])
    jax.block_until_ready(got)

    # reference on bf16-rounded inputs (kernel feeds bf16, accumulates in f32) -> tight
    ref_bf16 = char_cnn_ref(x_f32.astype(jnp.bfloat16).astype(jnp.float32), m,
                            params["conv_w"].astype(jnp.bfloat16).astype(jnp.float32),
                            params["conv_b"])
    # full-f32 reference (original PyTorch semantics) -> loose (bf16 input rounding only)
    ref_f32 = char_cnn_ref(x_f32, m, params["conv_w"], params["conv_b"])

    assert embeddings.shape == (bs, t_maxlen, token_emb_dim + char_emb_dim)
    assert masks.shape == (bs, t_maxlen)
    assert jnp.allclose(got, ref_bf16, rtol=1e-3, atol=1e-3)
    assert jnp.allclose(got, ref_f32, rtol=5e-2, atol=1e-2)

    # TODO(synk): CharLSTMEncoding branch (char_encoder != 'cnn') with packed sequences
    # is not implemented as a Pallas kernel.
    print("KERNEL_OK")
</pallas_src>

<mosaic_0001>
module attributes {stable_mosaic.version = 11 : i64} {
  func.func @char_cnn_kernel(%arg0: i32, %arg1: memref<16x128xbf16, #tpu.memory_space<vmem>>, %arg2: memref<16x8xf32, #tpu.memory_space<vmem>>, %arg3: memref<128x128xbf16, #tpu.memory_space<vmem>>, %arg4: memref<1x16xf32, #tpu.memory_space<vmem>>, %arg5: memref<16x16xf32, #tpu.memory_space<vmem>>) attributes {dimension_semantics = [#tpu.dimension_semantics<parallel>], iteration_bounds = array<i64: 2>, scalar_prefetch = 0 : i64, scratch_operands = 0 : i64, tpu.core_type = #tpu.core_type<tc>, window_params = [{transform_indices = @transform_0, window_bounds = array<i64: 16, 128>}, {transform_indices = @transform_1, window_bounds = array<i64: 16, 8>}, {pipeline_mode = #tpu.pipeline_mode<synchronous>, transform_indices = @transform_2, window_bounds = array<i64: 128, 128>}, {pipeline_mode = #tpu.pipeline_mode<synchronous>, transform_indices = @transform_3, window_bounds = array<i64: 1, 16>}, {transform_indices = @transform_4, window_bounds = array<i64: 16, 16>}]} {
    %c0 = arith.constant 0 : index
    %c0_0 = arith.constant 0 : index
    %0 = vector.load %arg1[%c0, %c0_0] : memref<16x128xbf16, #tpu.memory_space<vmem>>, vector<16x128xbf16>
    %c0_1 = arith.constant 0 : index
    %c0_2 = arith.constant 0 : index
    %1 = vector.load %arg3[%c0_1, %c0_2] : memref<128x128xbf16, #tpu.memory_space<vmem>>, vector<128x128xbf16>
    %cst = arith.constant dense<0.000000e+00> : vector<16x128xf32>
    %2 = tpu.matmul %0, %1, %cst {dimension_numbers = #tpu.dot_dimension_numbers<[1], [0], [0], [1], [0, 0, 1, 1], [], []>} : vector<16x128xbf16>, vector<128x128xbf16>, vector<16x128xf32> -> vector<16x128xf32>
    %c0_3 = arith.constant 0 : index
    %c0_4 = arith.constant 0 : index
    %3 = vector.load %arg2[%c0_3, %c0_4] : memref<16x8xf32, #tpu.memory_space<vmem>>, vector<16x8xf32>
    %cst_5 = arith.constant 1.000000e+00 : f32
    %4 = vector.broadcast %cst_5 : f32 to vector<16x8xf32>
    %5 = arith.subf %4, %3 : vector<16x8xf32>
    %cst_6 = arith.constant 9.990000e+02 : f32
    %6 = vector.broadcast %cst_6 : f32 to vector<16x8xf32>
    %7 = arith.mulf %5, %6 : vector<16x8xf32>
    %8 = vector.extract_strided_slice %2 {offsets = [0, 0], sizes = [16, 16], strides = [1, 1]} : vector<16x128xf32> to vector<16x16xf32>
    %9 = vector.extract_strided_slice %7 {offsets = [0, 0], sizes = [16, 1], strides = [1, 1]} : vector<16x8xf32> to vector<16x1xf32>
    %10 = vector.broadcast %9 : vector<16x1xf32> to vector<16x16xf32>
    %11 = arith.subf %8, %10 : vector<16x16xf32>
    %12 = vector.extract_strided_slice %2 {offsets = [0, 16], sizes = [16, 16], strides = [1, 1]} : vector<16x128xf32> to vector<16x16xf32>
    %13 = vector.extract_strided_slice %7 {offsets = [0, 1], sizes = [16, 1], strides = [1, 1]} : vector<16x8xf32> to vector<16x1xf32>
    %14 = vector.broadcast %13 : vector<16x1xf32> to vector<16x16xf32>
    %15 = arith.subf %12, %14 : vector<16x16xf32>
    %16 = arith.maximumf %11, %15 : vector<16x16xf32>
    %17 = vector.extract_strided_slice %2 {offsets = [0, 32], sizes = [16, 16], strides = [1, 1]} : vector<16x128xf32> to vector<16x16xf32>
    %18 = vector.extract_strided_slice %7 {offsets = [0, 2], sizes = [16, 1], strides = [1, 1]} : vector<16x8xf32> to vector<16x1xf32>
    %19 = vector.broadcast %18 : vector<16x1xf32> to vector<16x16xf32>
    %20 = arith.subf %17, %19 : vector<16x16xf32>
    %21 = arith.maximumf %16, %20 : vector<16x16xf32>
    %22 = vector.extract_strided_slice %2 {offsets = [0, 48], sizes = [16, 16], strides = [1, 1]} : vector<16x128xf32> to vector<16x16xf32>
    %23 = vector.extract_strided_slice %7 {offsets = [0, 3], sizes = [16, 1], strides = [1, 1]} : vector<16x8xf32> to vector<16x1xf32>
    %24 = vector.broadcast %23 : vector<16x1xf32> to vector<16x16xf32>
    %25 = arith.subf %22, %24 : vector<16x16xf32>
    %26 = arith.maximumf %21, %25 : vector<16x16xf32>
    %27 = vector.extract_strided_slice %2 {offsets = [0, 64], sizes = [16, 16], strides = [1, 1]} : vector<16x128xf32> to vector<16x16xf32>
    %28 = vector.extract_strided_slice %7 {offsets = [0, 4], sizes = [16, 1], strides = [1, 1]} : vector<16x8xf32> to vector<16x1xf32>
    %29 = vector.broadcast %28 : vector<16x1xf32> to vector<16x16xf32>
    %30 = arith.subf %27, %29 : vector<16x16xf32>
    %31 = arith.maximumf %26, %30 : vector<16x16xf32>
    %32 = vector.extract_strided_slice %2 {offsets = [0, 80], sizes = [16, 16], strides = [1, 1]} : vector<16x128xf32> to vector<16x16xf32>
    %33 = vector.extract_strided_slice %7 {offsets = [0, 5], sizes = [16, 1], strides = [1, 1]} : vector<16x8xf32> to vector<16x1xf32>
    %34 = vector.broadcast %33 : vector<16x1xf32> to vector<16x16xf32>
    %35 = arith.subf %32, %34 : vector<16x16xf32>
    %36 = arith.maximumf %31, %35 : vector<16x16xf32>
    %37 = vector.extract_strided_slice %2 {offsets = [0, 96], sizes = [16, 16], strides = [1, 1]} : vector<16x128xf32> to vector<16x16xf32>
    %38 = vector.extract_strided_slice %7 {offsets = [0, 6], sizes = [16, 1], strides = [1, 1]} : vector<16x8xf32> to vector<16x1xf32>
    %39 = vector.broadcast %38 : vector<16x1xf32> to vector<16x16xf32>
    %40 = arith.subf %37, %39 : vector<16x16xf32>
    %41 = arith.maximumf %36, %40 : vector<16x16xf32>
    %42 = vector.extract_strided_slice %2 {offsets = [0, 112], sizes = [16, 16], strides = [1, 1]} : vector<16x128xf32> to vector<16x16xf32>
    %43 = vector.extract_strided_slice %7 {offsets = [0, 7], sizes = [16, 1], strides = [1, 1]} : vector<16x8xf32> to vector<16x1xf32>
    %44 = vector.broadcast %43 : vector<16x1xf32> to vector<16x16xf32>
    %45 = arith.subf %42, %44 : vector<16x16xf32>
    %46 = arith.maximumf %41, %45 : vector<16x16xf32>
    %c0_7 = arith.constant 0 : index
    %c0_8 = arith.constant 0 : index
    %47 = vector.load %arg4[%c0_7, %c0_8] : memref<1x16xf32, #tpu.memory_space<vmem>>, vector<1x16xf32>
    %48 = vector.broadcast %47 : vector<1x16xf32> to vector<16x16xf32>
    %49 = arith.addf %46, %48 : vector<16x16xf32>
    %c0_9 = arith.constant 0 : index
    %c0_10 = arith.constant 0 : index
    %50 = vector.load %arg5[%c0_9, %c0_10] : memref<16x16xf32, #tpu.memory_space<vmem>>, vector<16x16xf32>
    tpu.vector_store %arg5[%c0_9, %c0_10], %49 {strides = array<i32>} : memref<16x16xf32, #tpu.memory_space<vmem>>, vector<16x16xf32>,
    return
  }
  func.func @transform_0(%arg0: i32) -> (i32, i32) {
    %c0_i32 = arith.constant 0 : i32
    %c0_i32_0 = arith.constant 0 : i32
    return %arg0, %c0_i32 : i32, i32
  }
  func.func @transform_1(%arg0: i32) -> (i32, i32) {
    %c0_i32 = arith.constant 0 : i32
    %c0_i32_0 = arith.constant 0 : i32
    return %arg0, %c0_i32 : i32, i32
  }
  func.func @transform_2(%arg0: i32) -> (i32, i32) {
    %c0_i32 = arith.constant 0 : i32
    %c0_i32_0 = arith.constant 0 : i32
    %c0_i32_1 = arith.constant 0 : i32
    return %c0_i32, %c0_i32_0 : i32, i32
  }
  func.func @transform_3(%arg0: i32) -> (i32, i32) {
    %c0_i32 = arith.constant 0 : i32
    %c0_i32_0 = arith.constant 0 : i32
    %c0_i32_1 = arith.constant 0 : i32
    return %c0_i32, %c0_i32_0 : i32, i32
  }
  func.func @transform_4(%arg0: i32) -> (i32, i32) {
    %c0_i32 = arith.constant 0 : i32
    %c0_i32_0 = arith.constant 0 : i32
    return %arg0, %c0_i32 : i32, i32
  }
}

</mosaic_0001>

<bundles_post_ra>
// kernel: all_embedding_forward.1
= control target key start
LH: loop header
LB: loop body
LE: loop exit
PB: predicated region body
PF: predicated region fallthrough
CT: control target
= control target key end

     0   :  { %s723_s15 = smov 0   ;;  %s781_s0 = inlined_call_operand.vmem [shape: bf16[32,128], index: 0, kind: input, shape index: {}]   ;;  %s782_s1 = inlined_call_operand.vmem [shape: f32[32,8], index: 1, kind: input, shape index: {}]   ;;  %s783_s2 = inlined_call_operand.vmem [shape: bf16[128,128], index: 2, kind: input, shape index: {}]   ;;  %s784_s3 = inlined_call_operand.vmem [shape: f32[1,16], index: 3, kind: input, shape index: {}]   ;;  %s785_s4 = inlined_call_operand.vmem [shape: f32[32,16], index: 4, kind: output, shape index: {}]  }
   0x1 LB: > { %s575_s16 = sadd.s32 4294967295, %s679_s15   ;;  %p579_p0 = scmp.ge.s32.totalorder %s679_s15, 1  ;;  %s679_s15 = sphi %s723_s15, %s14_s15  }
   0x2   : > { %p174_p1 = scmp.lt.s32.totalorder %s679_s15, 3 }
   0x4   : > { %p175_p2 = pnand %p579_p0, %p174_p1 }
   0x5   : > { %v664_v0 = vld [vmem:[%s783_s2] sm:$0xff] (!%p175_p2)   ;;  %v681_v1 = vmov (!%p175_p2), 0.0   ;;  %v665_v2 = vld [vmem:[%s783_s2 + $0x8] sm:$0xff] (!%p175_p2)   ;;  %vm682_vm0 = vmmov (!%p175_p2), 0   ;;  %s580_s21 = sshll.u32 (!%p175_p2), %s575_s16, 1  ;;  %v683_v3 = vmov (!%p175_p2), 2  }
   0x6   : > { %178 = sbr.rel (%p175_p2) target bundleno = 398 (0x18e), region = 36  ;;  %607 = vmatprep.subr.bf16.mxu0 (!%p175_p2), %v681_v1  ;;  %623 = vmatprep.mubr.msk.bf16.mxu0 (!%p175_p2), %vm682_vm0, %v681_v1  ;;  %p206_p3 = scmp.lt.s32.totalorder (!%p175_p2), %s580_s21, 3  ;;  %v666_v4 = vld [vmem:[%s783_s2 + $0x10] sm:$0xff] (!%p175_p2)   ;;  %v684_v5 = vmov (!%p175_p2), 1   ;;  %v667_v6 = vld [vmem:[%s783_s2 + $0x18] sm:$0xff] (!%p175_p2)   ;;  %v668_v12 = vld [vmem:[%s783_s2 + $0x20] sm:$0xff] (!%p175_p2)  }
   0x7   : > { %608 = vmatpush3.bf16.msra.mxu0 (!%p175_p2), %v664_v0  ;;  %653 = vset.pattern.permute.xlu1 (!%p175_p2), %v683_v3  ;;  %v669_v14 = vld [vmem:[%s783_s2 + $0x28] sm:$0xff] (!%p175_p2)   ;;  %v670_v15 = vld [vmem:[%s783_s2 + $0x30] sm:$0xff] (!%p175_p2)   ;;  %v685_v16 = vmov (!%p175_p2), 3   ;;  %v671_v17 = vld [vmem:[%s783_s2 + $0x38] sm:$0xff] (!%p175_p2)   ;;  %v686_v18 = vmov (!%p175_p2), 4   ;;  %v687_v20 = vmov (!%p175_p2), 5  }
   0x8   : > { %609 = vmatprep.subr.bf16.mxu0 (!%p175_p2), %v681_v1  ;;  %652 = vset.pattern.permute.xlu0 (!%p175_p2), %v684_v5  ;;  %v688_v21 = vmov (!%p175_p2), 6   ;;  %v689_v22 = vmov (!%p175_p2), 7   ;;  %v690_v23 = vmov (!%p175_p2), 0   ;;  %s691_s17 = smov (!%p175_p2), 112   ;;  %s692_s18 = smov (!%p175_p2), 96   ;;  %vm504_vm1 = vcmask (!%p175_p2), 130048  }
   0x9   : > { %s693_s19 = smov (!%p175_p2), 80   ;;  %s694_s20 = smov (!%p175_p2), 64  }
   0xa   : > { %s695_s22 = smov (!%p175_p2), 48   ;;  %s696_s23 = smov (!%p175_p2), 32  }
   0xb   : > { %610 = vmatpush3.bf16.msra.mxu0 (!%p175_p2), %v665_v2 }
   0xc   : > { %611 = vmatprep.subr.bf16.mxu0 (!%p175_p2), %v681_v1 }
   0xd   : > { %s787_s21 = smov (!%p206_p3, %s580_s21), 3 }
   0xe   : > { %s581_s24 = sshll.u32 %s787_s21, 2  ;;  %s583_s28 = sshll.u32 %s787_s21, 3 }
   0xf   : > { %s746_s27 = scalar_lea.vmem %s781_s0, %s581_s24  ;;  %s215_s5 = scalar_lea.vmem %s782_s1, %s583_s28  ;;  %612 = vmatpush3.bf16.msra.mxu0 %v666_v4 }
  0x10   : > { %v337_v7 = vld [vmem:[%s215_s5] sm:$0xff]  ;;  %v338_v8 = vld [vmem:[%s215_s5 + $0x8] sm:$0xff]  ;;  %613 = vmatprep.subr.bf16.mxu0 %v681_v1  ;;  %s697_s24 = smov 16   ;;  %s221_s30 = scalar_lea.vmem %s785_s4, %s583_s28 }
  0x11   : > { %v339_v9 = vsub.f32 1.0, %v337_v7  ;;  %v340_v10 = vsub.f32 1.0, %v338_v8  ;;  %v672_v19 = vld [vmem:[%s746_s27] sm:$0xff]  }
  0x13   : > { %v341_v11 = vmul.f32 999.0, %v339_v9  ;;  %614 = vmatpush3.bf16.msra.mxu0 %v667_v6  ;;  %v342_v13 = vmul.f32 999.0, %v340_v10 }
  0x14   : > { %615 = vmatprep.subr.bf16.mxu0 %v681_v1 }
  0x15   : > { %376 = vperm.xlu1 %653, %v341_v11   ;;  %356 = vperm.xlu0 %652, %v341_v11  }
  0x17   : > { %616 = vmatpush3.bf16.msra.mxu0 %v668_v12 }
  0x18   : > { %617 = vmatprep.subr.bf16.mxu0 %v681_v1 }
  0x19   : > { %380 = vperm.xlu1 %653, %v342_v13   ;;  %360 = vperm.xlu0 %652, %v342_v13  }
  0x1b   : > { %618 = vmatpush3.bf16.msra.mxu0 %v669_v14 }
  0x1c   : > { %619 = vmatprep.subr.bf16.mxu0 %v681_v1 }
  0x1d   : > { %655 = vset.pattern.permute.xlu1 %v685_v16  ;;  %654 = vset.pattern.permute.xlu0 %v685_v16 }
  0x1e   : > { %400 = vperm.xlu1 %655, %v342_v13   ;;  %396 = vperm.xlu0 %654, %v341_v11  }
  0x1f   : > { %620 = vmatpush3.bf16.msra.mxu0 %v670_v15 }
  0x20   : > { %621 = vmatprep.subr.bf16.mxu0 %v681_v1 }
  0x22   : > { %656 = vset.pattern.permute.xlu1 %v686_v18  ;;  %657 = vset.pattern.permute.xlu0 %v686_v18 }
  0x23   : > { %416 = vperm.xlu1 %656, %v341_v11   ;;  %622 = vmatpush3.bf16.msra.mxu0 %v671_v17 }
  0x24   : > { %420 = vperm.xlu0 %657, %v342_v13  }
  0x26   : > { %624 = vmatmul.mubr.bf16.vlgmr.msra.gmra.mrb[0].mxu0 %v672_v19  ;;  %v595_v19 = vld [vmem:[%s784_s3] ss:$0 sm:$0xff] }
  0x27   : > { %658 = vset.pattern.permute.xlu1 %v687_v20 }
  0x28   : > { %436 = vperm.xlu1 %658, %v341_v11   ;;  %659 = vset.pattern.permute.xlu0 %v688_v21 }
  0x29   : > { %456 = vperm.xlu0 %659, %v341_v11  }
  0x2c   : > { %440 = vperm.xlu1 %658, %v342_v13  }
  0x2d   : > { %662 = vset.pattern.permute.xlu0 %v689_v22 }
  0x2e   : > { %480 = vperm.xlu0 %662, %v342_v13  }
  0x30   : > { %660 = vset.pattern.permute.xlu1 %v688_v21 }
  0x31   : > { %460 = vperm.xlu1 %660, %v342_v13  }
  0x35   : > { %661 = vset.pattern.permute.xlu1 %v689_v22 }
  0x36   : > { %476 = vperm.xlu1 %661, %v341_v11  }
  0x3a   : > { %663 = vset.pattern.permute.xlu1 %v690_v23 }
  0x3b   : > { %345 = vperm.xlu1 %663, %v341_v11  }
  0x3f   : > { %350 = vperm.xlu1 %663, %v342_v13  }
  0x94   : > { %v377_v24 = vpop.permute.xlu1 %376  ;;  %v357_v26 = vpop.permute.xlu0 %356 }
  0x98   : > { %v381_v25 = vpop.permute.xlu1 %380  ;;  %v361_v28 = vpop.permute.xlu0 %360 }
  0x9d   : > { %v401_v27 = vpop.permute.xlu1 %400  ;;  %v397_v38 = vpop.permute.xlu0 %396 }
  0xa2   : > { %v417_v29 = vpop.permute.xlu1 %416 }
  0xa3   : > { %v421_v43 = vpop.permute.xlu0 %420 }
  0xa7   : > { %v437_v37 = vpop.permute.xlu1 %436 }
  0xa8   : > { %v457_v48 = vpop.permute.xlu0 %456 }
  0xab   : > { %v441_v42 = vpop.permute.xlu1 %440 }
  0xad   : > { %v481_v53 = vpop.permute.xlu0 %480 }
  0xb0   : > { %v461_v47 = vpop.permute.xlu1 %460 }
  0xb5   : > { %v477_v52 = vpop.permute.xlu1 %476 }
  0xba   : > { %v346_v56 = vpop.permute.xlu1 %345 }
  0xbe   : > { %v351_v57 = vpop.permute.xlu1 %350 }
  0xf9   : > { %v330_v30 = vpop.f32.mrb[0].mxu0 }
  0xfa   : > { %v625_v31 = vpop.f32.mrb[1].mxu0  ;;  %v363_v32 = vsub.f32 %v330_v30, %v357_v26  ;;  %v383_v36 = vsub.f32 %v330_v30, %v377_v24  ;;  %v403_v40 = vsub.f32 %v330_v30, %v397_v38  ;;  %v423_v44 = vsub.f32 %v330_v30, %v417_v29 }
  0xfb   : > { %v333_v33 = vpop.f32.mrb[2].mxu0  ;;  %v443_v46 = vsub.f32 %v330_v30, %v437_v37  ;;  %v463_v50 = vsub.f32 %v330_v30, %v457_v48  ;;  %v483_v54 = vsub.f32 %v330_v30, %v477_v52  ;;  %v353_v0 = vsub.f32 %v330_v30, %v346_v56 }
  0xfc   : > { %367 = vrot.lane.b32.xlu0 %v363_v32, %s691_s17  ;;  %v626_v34 = vpop.f32.mrb[3].mxu0  ;;  %v364_v35 = vsub.f32 %v333_v33, %v361_v28  ;;  %v384_v39 = vsub.f32 %v333_v33, %v381_v25  ;;  %v404_v41 = vsub.f32 %v333_v33, %v401_v27  ;;  %v424_v45 = vsub.f32 %v333_v33, %v421_v43 }
  0xfd   : > { %v444_v49 = vsub.f32 %v333_v33, %v441_v42  ;;  %v464_v51 = vsub.f32 %v333_v33, %v461_v47  ;;  %v484_v55 = vsub.f32 %v333_v33, %v481_v53  ;;  %v354_v3 = vsub.f32 %v333_v33, %v351_v57 }
  0xfe   : > { %369 = vrot.lane.b32.xlu1 %v364_v35, %s691_s17 }
 0x100   : > { %387 = vrot.lane.b32.xlu0 %v383_v36, %s692_s18 }
 0x102   : > { %389 = vrot.lane.b32.xlu1 %v384_v39, %s692_s18 }
 0x104   : > { %407 = vrot.lane.b32.xlu0 %v403_v40, %s693_s19 }
 0x106   : > { %409 = vrot.lane.b32.xlu1 %v404_v41, %s693_s19 }
 0x108   : > { %427 = vrot.lane.b32.xlu0 %v423_v44, %s694_s20 }
 0x10a   : > { %429 = vrot.lane.b32.xlu1 %v424_v45, %s694_s20 }
 0x10c   : > { %447 = vrot.lane.b32.xlu0 %v443_v46, %s695_s22 }
 0x10e   : > { %449 = vrot.lane.b32.xlu1 %v444_v49, %s695_s22 }
 0x110   : > { %467 = vrot.lane.b32.xlu0 %v463_v50, %s696_s23 }
 0x112   : > { %469 = vrot.lane.b32.xlu1 %v464_v51, %s696_s23 }
 0x114   : > { %487 = vrot.lane.b32.xlu0 %v483_v54, %s697_s24 }
 0x116   : > { %489 = vrot.lane.b32.xlu1 %v484_v55, %s697_s24 }
 0x16e   : > { %v368_v58 = vpop.permute.xlu0 %367 }
 0x16f   : > { %v373_v2 = vmax.f32 %v353_v0, %v368_v58 }
 0x170   : > { %v370_v59 = vpop.permute.xlu1 %369 }
 0x171   : > { %v374_v5 = vmax.f32 %v354_v3, %v370_v59 }
 0x172   : > { %v388_v60 = vpop.permute.xlu0 %387 }
 0x173   : > { %v393_v6 = vmax.f32 %v373_v2, %v388_v60 }
 0x174   : > { %v390_v61 = vpop.permute.xlu1 %389 }
 0x175   : > { %v394_v8 = vmax.f32 %v374_v5, %v390_v61 }
 0x176   : > { %v408_v62 = vpop.permute.xlu0 %407 }
 0x177   : > { %v413_v9 = vmax.f32 %v393_v6, %v408_v62 }
 0x178   : > { %v410_v63 = vpop.permute.xlu1 %409 }
 0x179   : > { %v414_v11 = vmax.f32 %v394_v8, %v410_v63 }
 0x17a   : > { %v428_v1 = vpop.permute.xlu0 %427 }
 0x17b   : > { %v433_v12 = vmax.f32 %v413_v9, %v428_v1 }
 0x17c   : > { %v430_v4 = vpop.permute.xlu1 %429 }
 0x17d   : > { %v434_v14 = vmax.f32 %v414_v11, %v430_v4 }
 0x17e   : > { %v448_v7 = vpop.permute.xlu0 %447 }
 0x17f   : > { %v453_v15 = vmax.f32 %v433_v12, %v448_v7 }
 0x180   : > { %v450_v10 = vpop.permute.xlu1 %449 }
 0x181   : > { %v454_v17 = vmax.f32 %v434_v14, %v450_v10 }
 0x182   : > { %v468_v13 = vpop.permute.xlu0 %467 }
 0x183   : > { %v473_v18 = vmax.f32 %v453_v15, %v468_v13 }
 0x184   : > { %v470_v16 = vpop.permute.xlu1 %469 }
 0x185   : > { %v474_v21 = vmax.f32 %v454_v17, %v470_v16 }
 0x186   : > { %v488_v20 = vpop.permute.xlu0 %487 }
 0x187   : > { %v493_v22 = vmax.f32 %v473_v18, %v488_v20 }
 0x188   : > { %v490_v23 = vpop.permute.xlu1 %489 }
 0x189   : > { %v502_v24 = vadd.f32 %v595_v19, %v493_v22  ;;  %v494_v25 = vmax.f32 %v474_v21, %v490_v23 }
 0x18b   : > { %505 = vst.msk [vmem:[%s221_s30] sm:$0xff] %vm504_vm1, %v502_v24  ;;  %v503_v26 = vadd.f32 %v595_v19, %v494_v25 }
 0x18d   : > { %506 = vst.msk [vmem:[%s221_s30 + $0x8] sm:$0xff] %vm504_vm1, %v503_v26 }
 0x18e PF: > { %s14_s15 = sadd.s32 1, %s679_s15  }
 0x18f   : > { %p11_p4 = scmp.ge.s32.totalorder %s14_s15, 4  }
 0x191   :  { %13 = sbr.rel (!%p11_p4) target bundleno = 1 (0x1), region = 69 }

</bundles_post_ra>
